<compile_context>
chip_gen: v5e
topology: v5e:2x2
jax: 0.10.0
libtpu: 0.0.40
codegen_flags: <defaults>
</compile_context>

<pallas_src>
import jax
import jax.numpy as jnp
import numpy as np
from jax.experimental import pallas as pl
from jax.experimental.pallas import tpu as pltpu


def attention_kernel(x_ref, w_ref, o_ref):
    # x_ref : (TB, S, D)     batch tile of the (already split-reshaped) input
    # w_ref : (D, 2*H*P)     packed weights [ Wp | Wq_rep ]
    # o_ref : (TB, H*P)      pooled output; head h occupies columns [h*P, (h+1)*P)
    TB, HP = o_ref.shape
    _, S, D = x_ref.shape

    # Merge leading dims; lane dim (D) unchanged -> layout-free.
    x = x_ref[...].reshape(TB * S, D)

    # ONE MXU pass for ALL heads: projections AND attention logits together.
    #   y[:, :HP] = x @ Wp              (per-head projections, column-blocked)
    #   y[:, HP:] = x @ (W_h q_h)       (per-head logits, replicated over that head's P cols)
    y = jnp.dot(x, w_ref[...], preferred_element_type=jnp.float32)   # (TB*S, 2*HP) f32

    xp = y[:, :HP].reshape(TB, S, HP)                                 # (TB, S, HP)
    logits = y[:, HP:].reshape(TB, S, HP)                             # (TB, S, HP)

    # LeakyReLU(0.2)
    logits = jnp.where(logits >= 0.0, logits, 0.2 * logits)

    # Softmax over the split axis.  Columns inside a head's P-block are identical,
    # so this matches the scalar per-head softmax + broadcast of the reference.
    m = jnp.max(logits, axis=1, keepdims=True)                        # (TB, 1, HP)
    e = jnp.exp(logits - m)                                           # (TB, S, HP)
    denom = jnp.sum(e, axis=1, keepdims=True)                         # (TB, 1, HP)
    att = e / denom                                                   # exact reciprocal

    # Weighted pooling over the split axis -> lane-dense (TB, H*P) output
    # (== torch.cat(per-head outputs, dim=1)).
    o_ref[...] = jnp.sum(xp * att, axis=1).astype(o_ref.dtype)


def attention_module_forward(x, W, q, *, rows_per_block=2048, compute_dtype=jnp.float32):
    """x: (B, S, D) float32; W: (H, D, P) stored transposed so y = x @ W[h]; q: (H, P, 1).

    Returns (B, H*P) == torch.cat([head_0, ..., head_{H-1}], dim=1).
    """
    B, S, D = x.shape
    H, _, P = W.shape
    HP = H * P

    # ---------------- weight packing (tiny one-off XLA ops in the wrapper) --------
    # Per-head projection weights packed column-blockwise: (D, H*P).
    Wp = jnp.transpose(W, (1, 0, 2)).reshape(D, HP)
    # Pre-fold q into W:  Wq[h] = W[h] @ q[h]  -> (D,), replicated across the head's
    # P columns so the scalar logit lands lane-replicated after the matmul.
    wq = jnp.einsum("hdp,hp->hd", W, q[:, :, 0])                      # (H, D)
    Wq_rep = jnp.repeat(wq.T, P, axis=1)                              # (D, H*P)
    # Single packed weight: one MXU pass produces projections AND logits.
    W_all = jnp.concatenate([Wp, Wq_rep], axis=1)                     # (D, 2*H*P)

    if compute_dtype != jnp.float32:
        # Optional bf16 operands (single-pass vmatmul on v6e/v7x).  Accumulation is
        # still f32 via preferred_element_type; softmax / pooling math stays f32.
        x = x.astype(compute_dtype)
        W_all = W_all.astype(compute_dtype)

    # ---------------- batch tiling: amortize launch overhead ----------------------
    # NOTE: S should stay a multiple of 8 (sublane tile) so the in-kernel
    # (TB, S, D) -> (TB*S, D) reshape is layout-free.
    TB = min(B, max(1, rows_per_block // S))
    if TB < B:
        TB = max(8, (TB // 8) * 8)        # multiple of 8 sublanes for the output block
    Bp = -(-B // TB) * TB
    if Bp != B:
        # Zero padding is harmless: padded rows never reach the returned slice.
        x = jnp.concatenate([x, jnp.zeros((Bp - B, S, D), x.dtype)], axis=0)
    grid = (Bp // TB,)

    out = pl.pallas_call(
        attention_kernel,
        out_shape=jax.ShapeDtypeStruct((Bp, HP), jnp.float32),
        grid=grid,
        in_specs=[
            pl.BlockSpec((TB, S, D), lambda i: (i, 0, 0)),     # batch tile of x
            pl.BlockSpec((D, 2 * HP), lambda i: (0, 0)),       # packed weights (resident)
        ],
        out_specs=pl.BlockSpec((TB, HP), lambda i: (i, 0)),
        compiler_params=pltpu.CompilerParams(
            # Independent batch tiles: shards grid steps across both TensorCores on
            # v7x; harmless on single-TC v5e/v6e.
            dimension_semantics=("parallel",),
        ),
    )(x, W_all)
    return out[:B]


def reference_forward(x, W, q):
    """Pure-JAX reference mirroring the PyTorch forward (per-head loop, exact softmax)."""
    H = W.shape[0]
    outs = []
    for h in range(H):
        x_ = jnp.einsum("bsd,dp->bsp", x, W[h])
        att = jnp.einsum("bsp,po->bso", x_, q[h])
        att = jnp.where(att >= 0, att, 0.2 * att)
        att = jax.nn.softmax(att, axis=1)
        outs.append(jnp.sum(x_ * att, axis=1))
    return jnp.concatenate(outs, axis=1)


def glorot_uniform(key, shape, fan_in, fan_out, gain=1.0):
    limit = gain * np.sqrt(6.0 / (fan_in + fan_out))
    return jax.random.uniform(key, shape, jnp.float32, -limit, limit)


if __name__ == "__main__":
    # Module hyperparameters (small, consistent with the forward pass).
    input_dim = 32                     # D
    num_heads = 4                      # H
    split = 8                          # S (softmax / pooling axis)
    per_dim = input_dim // num_heads   # P = 8
    batch = 2                          # B

    key = jax.random.PRNGKey(0)
    kx, kw, kq = jax.random.split(key, 3)

    # Input: the torch code resizes x to (B, split, input_dim); we build it directly.
    x = jax.random.normal(kx, (batch, split, input_dim), jnp.float32)

    # Per-head Linear weights (no bias), stored transposed: W[h] is (D, P), y = x @ W[h].
    wkeys = jax.random.split(kw, num_heads)
    W = jnp.stack([
        glorot_uniform(wkeys[h], (input_dim, per_dim), fan_in=input_dim, fan_out=per_dim)
        for h in range(num_heads)
    ])  # (H, D, P)

    # Per-head attention vectors q: xavier_uniform with gain=1.414, shape (P, 1).
    qkeys = jax.random.split(kq, num_heads)
    q = jnp.stack([
        glorot_uniform(qkeys[h], (per_dim, 1), fan_in=1, fan_out=per_dim, gain=1.414)
        for h in range(num_heads)
    ])  # (H, P, 1)

    out = attention_module_forward(x, W, q)
    out = jax.block_until_ready(out)

    ref = reference_forward(x, W, q)
    assert out.shape == (batch, input_dim), out.shape
    # Exact (non-approx) softmax reciprocal and f32 operands -> tight tolerance again.
    # (The W·q pre-fold only changes f32 rounding order.)
    np.testing.assert_allclose(np.asarray(out), np.asarray(ref), rtol=1e-5, atol=1e-5)

    print("KERNEL_OK")
</pallas_src>

<mosaic_0001>
module attributes {stable_mosaic.version = 11 : i64} {
  func.func @attention_kernel(%arg0: i32, %arg1: memref<2x8x32xf32, #tpu.memory_space<vmem>>, %arg2: memref<32x64xf32, #tpu.memory_space<vmem>>, %arg3: memref<2x32xf32, #tpu.memory_space<vmem>>) attributes {dimension_semantics = [#tpu.dimension_semantics<parallel>], iteration_bounds = array<i64: 1>, scalar_prefetch = 0 : i64, scratch_operands = 0 : i64, tpu.core_type = #tpu.core_type<tc>, window_params = [{transform_indices = @transform_0, window_bounds = array<i64: 2, 8, 32>}, {pipeline_mode = #tpu.pipeline_mode<synchronous>, transform_indices = @transform_1, window_bounds = array<i64: 32, 64>}, {transform_indices = @transform_2, window_bounds = array<i64: 2, 32>}]} {
    %c0 = arith.constant 0 : index
    %c0_0 = arith.constant 0 : index
    %c0_1 = arith.constant 0 : index
    %0 = vector.load %arg1[%c0, %c0_0, %c0_1] : memref<2x8x32xf32, #tpu.memory_space<vmem>>, vector<2x8x32xf32>
    %1 = vector.shape_cast %0 : vector<2x8x32xf32> to vector<16x32xf32>
    %c0_2 = arith.constant 0 : index
    %c0_3 = arith.constant 0 : index
    %2 = vector.load %arg2[%c0_2, %c0_3] : memref<32x64xf32, #tpu.memory_space<vmem>>, vector<32x64xf32>
    %cst = arith.constant dense<0.000000e+00> : vector<16x64xf32>
    %3 = tpu.matmul %1, %2, %cst {dimension_numbers = #tpu.dot_dimension_numbers<[1], [0], [0], [1], [0, 0, 1, 1], [], []>} : vector<16x32xf32>, vector<32x64xf32>, vector<16x64xf32> -> vector<16x64xf32>
    %4 = vector.extract_strided_slice %3 {offsets = [0, 0], sizes = [16, 32], strides = [1, 1]} : vector<16x64xf32> to vector<16x32xf32>
    %5 = vector.shape_cast %4 : vector<16x32xf32> to vector<2x8x32xf32>
    %6 = vector.extract_strided_slice %3 {offsets = [0, 32], sizes = [16, 32], strides = [1, 1]} : vector<16x64xf32> to vector<16x32xf32>
    %7 = vector.shape_cast %6 : vector<16x32xf32> to vector<2x8x32xf32>
    %cst_4 = arith.constant 0.000000e+00 : f32
    %8 = vector.broadcast %cst_4 : f32 to vector<2x8x32xf32>
    %9 = arith.cmpf oge, %7, %8 : vector<2x8x32xf32>
    %cst_5 = arith.constant 2.000000e-01 : f32
    %10 = vector.broadcast %cst_5 : f32 to vector<2x8x32xf32>
    %11 = arith.mulf %10, %7 : vector<2x8x32xf32>
    %12 = arith.select %9, %7, %11 : vector<2x8x32xi1>, vector<2x8x32xf32>
    %cst_6 = arith.constant dense<0xFF800000> : vector<2x32xf32>
    %13 = vector.multi_reduction <maximumf>, %12, %cst_6 [1] : vector<2x8x32xf32> to vector<2x32xf32>
    %14 = vector.shape_cast %13 : vector<2x32xf32> to vector<2x1x32xf32>
    %15 = vector.broadcast %14 : vector<2x1x32xf32> to vector<2x8x32xf32>
    %16 = arith.subf %12, %15 : vector<2x8x32xf32>
    %17 = math.exp %16 : vector<2x8x32xf32>
    %cst_7 = arith.constant dense<0.000000e+00> : vector<2x32xf32>
    %18 = vector.multi_reduction <add>, %17, %cst_7 [1] : vector<2x8x32xf32> to vector<2x32xf32>
    %19 = vector.shape_cast %18 : vector<2x32xf32> to vector<2x1x32xf32>
    %20 = vector.broadcast %19 : vector<2x1x32xf32> to vector<2x8x32xf32>
    %21 = arith.divf %17, %20 : vector<2x8x32xf32>
    %22 = arith.mulf %5, %21 : vector<2x8x32xf32>
    %cst_8 = arith.constant dense<0.000000e+00> : vector<2x32xf32>
    %23 = vector.multi_reduction <add>, %22, %cst_8 [1] : vector<2x8x32xf32> to vector<2x32xf32>
    %c0_9 = arith.constant 0 : index
    %c0_10 = arith.constant 0 : index
    %24 = vector.load %arg3[%c0_9, %c0_10] : memref<2x32xf32, #tpu.memory_space<vmem>>, vector<2x32xf32>
    tpu.vector_store %arg3[%c0_9, %c0_10], %23 {strides = array<i32>} : memref<2x32xf32, #tpu.memory_space<vmem>>, vector<2x32xf32>,
    return
  }
  func.func @transform_0(%arg0: i32) -> (i32, i32, i32) {
    %c0_i32 = arith.constant 0 : i32
    %c0_i32_0 = arith.constant 0 : i32
    %c0_i32_1 = arith.constant 0 : i32
    return %arg0, %c0_i32, %c0_i32_0 : i32, i32, i32
  }
  func.func @transform_1(%arg0: i32) -> (i32, i32) {
    %c0_i32 = arith.constant 0 : i32
    %c0_i32_0 = arith.constant 0 : i32
    %c0_i32_1 = arith.constant 0 : i32
    return %c0_i32, %c0_i32_0 : i32, i32
  }
  func.func @transform_2(%arg0: i32) -> (i32, i32) {
    %c0_i32 = arith.constant 0 : i32
    %c0_i32_0 = arith.constant 0 : i32
    return %arg0, %c0_i32 : i32, i32
  }
}

</mosaic_0001>

<bundles_post_ra>
// kernel: tpu_custom_call.1
= control target key start
LH: loop header
LB: loop body
LE: loop exit
PB: predicated region body
PF: predicated region fallthrough
CT: control target
= control target key end

     0   :  { %7 = vsyncpa [#allocation3], 0  ;;  %s348_s0 = inlined_call_operand.hbm [shape: f32[2,8,32], index: 0, kind: input, shape index: {}]   ;;  %s349_s1 = inlined_call_operand.hbm [shape: f32[32,64], index: 1, kind: input, shape index: {}]   ;;  %s350_s2 = inlined_call_operand.hbm [shape: f32[2,32], index: 2, kind: output, shape index: {}]  }
   0x1   :  { %8 = vsyncpa [#allocation6], 0 }
   0x2   :  { %9 = vsyncpa [#allocation4], 0  ;;  %s14_s11 = sshll.u32 %s348_s0, 4  ;;  %s298_s12 = smov [#allocation2]   ;;  %s15_s11 = int_to_ptr.hbm [resolvable:$true] %s14_s11 }
   0x3   :  { %s16_s13 = sshll.u32 %s298_s12, 4  ;;  %s27_s16 = sshll.u32 %s349_s1, 4  ;;  %s17_s13 = int_to_ptr.vmem [resolvable:$true] %s16_s13  ;;  %s28_s16 = int_to_ptr.hbm [resolvable:$true] %s27_s16 }
   0x4   :  { %s299_s17 = smov 128   ;;  %s300_s18 = smov 8  }
   0x5   :  { %22 = dma.hbm_to_vmem [thread:$0]  %s15_s11, 256, %s17_s13, [#allocation3], %s299_s17, %s299_s17, %s300_s18  }
   0x6   :  { %s301_s19 = smov [#allocation5]  }
   0x7   :  { %s29_s20 = sshll.u32 %s301_s19, 4  ;;  %s30_s20 = int_to_ptr.vmem [resolvable:$true] %s29_s20 }
   0x8   :  { %35 = dma.hbm_to_vmem [thread:$0]  %s28_s16, 512, %s30_s20, [#allocation6], %s299_s17, %s299_s17, %s300_s18  }
   0x9   :  { %292 = dma.done.wait [#allocation3], 256  }
   0xa   :  { %293 = vsyncadd [#allocation3], 4294967040 }
   0xb   :  { %294 = dma.done.wait [#allocation6], 512  }
   0xc   :  { %295 = vsyncadd [#allocation6], 4294966784  ;;  %v49_v0 = vld [vmem:[#allocation5 + $0x18] sm:$0xff]  ;;  %v48_v1 = vld [vmem:[#allocation5 + $0x10] sm:$0xff]  ;;  %vm50_vm0 = vcmask 261120   ;;  %vm86_vm1 = vcmask 523520  }
   0xd   :  { %69 = vmatpush.msra.mxu0 %v49_v0  ;;  %202 = vmatpush.msra.mxu1 %v49_v0  ;;  %v47_v2 = vld [vmem:[#allocation5 + $0x8] sm:$0xff]  ;;  %v46_v3 = vld [vmem:[#allocation5] sm:$0xff]  ;;  %v44_v4 = vld [vmem:[#allocation2] sm:$0xff]  ;;  %s302_s0 = smov 96   ;;  %s303_s1 = smov [#allocation7]   ;;  %vm177_vm12 = vcmask 1041409  }
   0xe   :  { %v45_v5 = vld [vmem:[#allocation2 + $0x8] sm:$0xff]  ;;  %s187_s21 = sshll.u32 %s303_s1, 4  ;;  %s189_s24 = sshll.u32 %s350_s2, 4  ;;  %vm180_vm13 = vcmask 254976   ;;  %s188_s21 = int_to_ptr.vmem [resolvable:$true] %s187_s21  ;;  %s190_s24 = int_to_ptr.hbm [resolvable:$true] %s189_s24 }
   0xf   :  { %70 = vmatpush.msra.mxu0 %v48_v1  ;;  %203 = vmatpush.msra.mxu1 %v48_v1 }
  0x11   :  { %71 = vmatpush.msra.mxu0 %v47_v2  ;;  %204 = vmatpush.msra.mxu1 %v47_v2 }
  0x13   :  { %72 = vmatpush.msra.mxu0 %v46_v3  ;;  %205 = vmatpush.msra.mxu1 %v46_v3 }
  0x14   :  { %200 = vmatmul.msk.f32.vlgmr.msra.gmra.mxu0 %vm50_vm0, %v44_v4  ;;  %201 = vmatmul.msk.f32.vlgmr.msra.gmra.mxu1 %vm50_vm0, %v45_v5 }
  0x91   :  { %v327_v6 = vpop.f32.mrf.mxu0  ;;  %v329_v7 = vpop.f32.mrf.mxu1 }
  0x92   :  { %vm80_vm2 = vcmp.ge.f32.partialorder %v327_v6, 0.0  ;;  %v82_v8 = vmul.f32 0.2, %v327_v6  ;;  %vm81_vm3 = vcmp.ge.f32.partialorder %v329_v7, 0.0  ;;  %v83_v9 = vmul.f32 0.2, %v329_v7 }
  0x94   :  { %v84_v10 = vsel %vm80_vm2, %v327_v6, %v82_v8  ;;  %v85_v11 = vsel %vm81_vm3, %v329_v7, %v83_v9 }
  0x95   :  { %v87_v12 = vsel %vm86_vm1, %v84_v10, -inf  ;;  %v94_v13 = vsel %vm86_vm1, %v85_v11, -inf }
  0x96   :  { %v88_v14 = vrot.slane %v87_v12, 4  ;;  %v95_v15 = vrot.slane %v94_v13, 4 }
  0x98   :  { %v89_v16 = vmax.f32 %v87_v12, %v88_v14  ;;  %v96_v17 = vmax.f32 %v94_v13, %v95_v15 }
  0x9a   :  { %v90_v18 = vrot.slane %v89_v16, 2  ;;  %v97_v19 = vrot.slane %v96_v17, 2 }
  0x9c   :  { %v91_v20 = vmax.f32 %v89_v16, %v90_v18  ;;  %v98_v21 = vmax.f32 %v96_v17, %v97_v19 }
  0x9e   :  { %v92_v22 = vrot.slane %v91_v20, 1  ;;  %v99_v23 = vrot.slane %v98_v21, 1 }
  0xa0   :  { %v93_v24 = vmax.f32 %v91_v20, %v92_v22  ;;  %v100_v25 = vmax.f32 %v98_v21, %v99_v23 }
  0xa2   :  { %v101_v26 = vsub.f32 %v84_v10, %v93_v24  ;;  %v102_v27 = vsub.f32 %v85_v11, %v100_v25 }
  0xa4   :  { %v103_v28 = vmul.f32 1.442695, %v101_v26  ;;  %v105_v29 = vmul.f32 1.442695, %v102_v27 }
  0xa6   :  { %212 = vpow2.f32 %v103_v28 }
  0xa7   :  { %214 = vpow2.f32 %v105_v29 }
  0xac   :  { %v213_v30 = vpop.eup %212 }
  0xad   :  { %v215_v31 = vpop.eup %214  ;;  %v107_v32 = vsel %vm86_vm1, %v213_v30, 0.0 }
  0xae   :  { %v108_v33 = vrot.slane %v107_v32, 4  ;;  %v114_v34 = vsel %vm86_vm1, %v215_v31, 0.0 }
  0xaf   :  { %v115_v35 = vrot.slane %v114_v34, 4 }
  0xb0   :  { %v109_v36 = vadd.f32 %v108_v33, %v107_v32 }
  0xb1   :  { %v116_v37 = vadd.f32 %v115_v35, %v114_v34 }
  0xb2   :  { %v110_v38 = vrot.slane %v109_v36, 2 }
  0xb3   :  { %v117_v39 = vrot.slane %v116_v37, 2 }
  0xb4   :  { %v111_v40 = vadd.f32 %v110_v38, %v109_v36 }
  0xb5   :  { %v118_v41 = vadd.f32 %v117_v39, %v116_v37 }
  0xb6   :  { %v112_v42 = vrot.slane %v111_v40, 1 }
  0xb7   :  { %v119_v43 = vrot.slane %v118_v41, 1 }
  0xb8   :  { %v113_v44 = vadd.f32 %v112_v42, %v111_v40 }
  0xb9   :  { %v120_v45 = vadd.f32 %v119_v43, %v118_v41 }
  0xba   :  { %216 = vrcp.f32 %v113_v44  ;;  %v132_v51 = vand.u32 2147483648, %v113_v44  ;;  %v130_v54 = vand.u32 2147483647, %v113_v44  ;;  %vm126_vm5 = vweird.f32 %v113_v44 }
  0xbb   :  { %218 = vrcp.f32 %v120_v45  ;;  %v147_v61 = vand.u32 2147483648, %v120_v45  ;;  %vm141_vm9 = vweird.f32 %v120_v45  ;;  %v145_v63 = vand.u32 2147483647, %v120_v45 }
  0xbc   :  { %v133_v57 = vor.u32 1.1754944e-38, %v132_v51  ;;  %vm131_vm7 = vcmp.eq.f32.partialorder %v130_v54, 8.507059e+37 }
  0xbd   :  { %v148_v1 = vor.u32 1.1754944e-38, %v147_v61  ;;  %vm146_vm11 = vcmp.eq.f32.partialorder %v145_v63, 8.507059e+37 }
  0xc0   :  { %v217_v46 = vpop.eup %216 }
  0xc1   :  { %v219_v47 = vpop.eup %218  ;;  %v122_v48 = vmul.f32 %v217_v46, %v113_v44  ;;  %vm127_vm4 = vweird.f32 %v217_v46 }
  0xc2   :  { %v137_v49 = vmul.f32 %v219_v47, %v120_v45  ;;  %vm128_vm6 = vmor %vm126_vm5, %vm127_vm4  ;;  %vm142_vm8 = vweird.f32 %v219_v47 }
  0xc3   :  { %v123_v50 = vsub.f32 1.0, %v122_v48  ;;  %vm143_vm10 = vmor %vm141_vm9, %vm142_vm8 }
  0xc4   :  { %v138_v52 = vsub.f32 1.0, %v137_v49 }
  0xc5   :  { %v124_v53 = vmul.f32 %v217_v46, %v123_v50 }
  0xc6   :  { %v139_v55 = vmul.f32 %v219_v47, %v138_v52 }
  0xc7   :  { %v125_v56 = vadd.f32 %v217_v46, %v124_v53 }
  0xc8   :  { %v140_v59 = vadd.f32 %v219_v47, %v139_v55 }
  0xc9   :  { %v129_v58 = vsel %vm128_vm6, %v217_v46, %v125_v56 }
  0xca   :  { %v134_v60 = vsel %vm131_vm7, %v133_v57, %v129_v58  ;;  %v144_v0 = vsel %vm143_vm10, %v219_v47, %v140_v59 }
  0xcb   :  { %v135_v62 = vmul.f32 %v213_v30, %v134_v60  ;;  %v149_v2 = vsel %vm146_vm11, %v148_v1, %v144_v0 }
  0xcc   :  { %v150_v3 = vmul.f32 %v215_v31, %v149_v2 }
  0xcd   :  { %153 = vrot.lane.b32.xlu0 %v135_v62, %s302_s0 }
  0xd5   :  { %155 = vrot.lane.b32.xlu0 %v150_v3, %s302_s0 }
 0x13f   :  { %v154_v4 = vpop.permute.xlu0 %153 }
 0x140   :  { %v159_v5 = vmul.f32 %v154_v4, %v327_v6 }
 0x142   :  { %v161_v8 = vsel %vm50_vm0, %v159_v5, 0.0 }
 0x143   :  { %v162_v9 = vrot.slane %v161_v8, 4 }
 0x145   :  { %v163_v10 = vadd.f32 %v162_v9, %v161_v8 }
 0x147   :  { %v156_v11 = vpop.permute.xlu0 %155  ;;  %v164_v13 = vrot.slane %v163_v10, 2 }
 0x148   :  { %v160_v12 = vmul.f32 %v156_v11, %v329_v7 }
 0x149   :  { %v165_v16 = vadd.f32 %v164_v13, %v163_v10 }
 0x14a   :  { %v168_v14 = vsel %vm50_vm0, %v160_v12, 0.0 }
 0x14b   :  { %v169_v15 = vrot.slane %v168_v14, 4  ;;  %v166_v19 = vrot.slane %v165_v16, 1 }
 0x14d   :  { %v170_v17 = vadd.f32 %v169_v15, %v168_v14  ;;  %v167_v6 = vadd.f32 %v166_v19, %v165_v16 }
 0x14f   :  { %v171_v18 = vrot.slane %v170_v17, 2 }
 0x151   :  { %v172_v20 = vadd.f32 %v171_v18, %v170_v17 }
 0x153   :  { %v173_v21 = vrot.slane %v172_v20, 1 }
 0x155   :  { %v174_v22 = vadd.f32 %v173_v21, %v172_v20 }
 0x157   :  { %v178_v7 = vsel %vm177_vm12, %v174_v22, %v167_v6 }
 0x158   :  { %181 = vst.msk [vmem:[#allocation7] sm:$0x3] %vm180_vm13, %v178_v7 }
 0x159   :  { %192 = dma.vmem_to_hbm [thread:$0]  %s188_s21, 32, %s190_s24, [#allocation4]  }
 0x15a   :  { %296 = dma.done.wait [#allocation4], 32  }
 0x15b   :  { %297 = vsyncadd [#allocation4], 4294967264 }
 0x15c   :  { %197 = vsyncpa [#allocation3], 1 }
 0x15d   :  { %198 = vsyncpa [#allocation6], 1 }
 0x15e   :  { %199 = vsyncpa [#allocation4], 1 }

</bundles_post_ra>
